<compile_context>
chip_gen: v7x
topology: tpu7x:2x2x1
jax: 0.10.0
libtpu: 0.0.40
codegen_flags: <defaults>
</compile_context>

<pallas_src>
import jax
import jax.numpy as jnp
from jax.experimental import pallas as pl
from jax.experimental.pallas import tpu as pltpu

NEGATIVE_SLOPE = -0.31682124

_LANE = 128
_SUBLANE = 8
_TILE_VMEM_BUDGET = 20 * 1024 * 1024   # bytes reserved for double-buffered x/out tiles
_SMALL_PROBLEM_BYTES = 2 * 1024 * 1024 # whole-problem footprint below which grid collapses
_SMALL_PROBLEM_MAX_N = 16
_MAX_TILE = 65536                      # lane-dense tile cap (multiple of 128)


def _round_up(v: int, m: int) -> int:
    return (v + m - 1) // m * m


def _conv1x1_leaky_kernel(x_ref, w_ref, b_ref, o_ref):
    # x_ref: (Nb, Cin, T)  w_ref: (Cout, Cin)  b_ref: (Cout, 1)  o_ref: (Nb, Cout, T)
    w = w_ref[...]
    b = b_ref[...]
    # Nb is a small static block dim (1 in the tiled path, N in the collapsed path);
    # unrolled 2-D matmuls keep the MXU/VPU path simple and lane-dense.
    for i in range(x_ref.shape[0]):
        v = jnp.dot(w, x_ref[i], preferred_element_type=jnp.float32) + b
        o_ref[i] = jnp.where(v > 0, v, v * NEGATIVE_SLOPE)


def _plan_tiling(N, Cin, Cout, HW):
    """Returns (nb, num_n, tile, num_t, hw_pad)."""
    hw128 = _round_up(HW, _LANE)

    # Double-buffered x+out cost per spatial column, padded-channel estimate.
    bytes_per_col = 2 * 4 * (_round_up(Cin, _SUBLANE) + _round_up(Cout, _SUBLANE))
    t_budget = max((_TILE_VMEM_BUDGET // bytes_per_col) // _LANE * _LANE, _LANE)
    t_budget = min(t_budget, _MAX_TILE)

    if hw128 <= t_budget:
        num_t, tile = 1, hw128
    else:
        num_t = pl.cdiv(hw128, t_budget)
        tile = _round_up(pl.cdiv(hw128, num_t), _LANE)   # balance tile sizes
    hw_pad = num_t * tile

    total_bytes = 4 * N * (Cin + Cout) * hw_pad
    small = (total_bytes <= _SMALL_PROBLEM_BYTES) and (N <= _SMALL_PROBLEM_MAX_N)

    if num_t == 1 and small:
        nb, num_n = N, 1          # single grid step, whole problem in one block
    else:
        nb, num_n = 1, N

    # v7x megacore: a large single-step grid leaves one TensorCore idle.
    if num_n * num_t < 2 and not small:
        num_t = 2
        tile = _round_up(pl.cdiv(hw128, num_t), _LANE)
        hw_pad = num_t * tile

    return nb, num_n, tile, num_t, hw_pad


def conv1x1_leaky(x_nchw, weight, bias):
    """x_nchw: (N, Cin, H, W) f32; weight: (Cout, Cin) f32; bias: (Cout,) f32."""
    N, Cin, H, W = x_nchw.shape
    Cout = weight.shape[0]
    HW = H * W

    nb, num_n, tile, num_t, hw_pad = _plan_tiling(N, Cin, Cout, HW)

    # NCHW -> (N, Cin, H*W): pure reshape (no transpose). Pad spatial axis to the
    # tiled extent so every store is lane-dense and unmasked; tail sliced off below.
    x_flat = x_nchw.reshape(N, Cin, HW)
    if hw_pad != HW:
        x_flat = jnp.pad(x_flat, ((0, 0), (0, 0), (0, hw_pad - HW)))
    b = bias.reshape(Cout, 1)

    grid = (num_n, num_t)

    # VMEM limit from the actual double-buffered footprint, with 2x headroom,
    # clamped well under v7x's 32 MiB scoped default / 64 MiB physical VMEM.
    tile_bytes = 2 * 4 * nb * (Cin + Cout) * tile
    const_bytes = 2 * 4 * (Cout * Cin + Cout)
    vmem_limit = min(max(2 * (tile_bytes + const_bytes), 8 * 1024 * 1024),
                     48 * 1024 * 1024)

    cost = pl.CostEstimate(
        flops=2 * N * HW * Cin * Cout,
        transcendentals=0,
        bytes_accessed=4 * (N * Cin * HW + Cin * Cout + Cout + N * Cout * HW),
    )

    out_flat = pl.pallas_call(
        _conv1x1_leaky_kernel,
        out_shape=jax.ShapeDtypeStruct((N, Cout, hw_pad), jnp.float32),
        grid=grid,
        in_specs=[
            # x tile: (nb, Cin, T) with T on the lane axis
            pl.BlockSpec((nb, Cin, tile), lambda n, t: (n, 0, t)),
            # weight / bias: tiny, constant block index -> fetched once, resident
            pl.BlockSpec((Cout, Cin), lambda n, t: (0, 0)),
            pl.BlockSpec((Cout, 1), lambda n, t: (0, 0)),
        ],
        out_specs=pl.BlockSpec((nb, Cout, tile), lambda n, t: (n, 0, t)),
        compiler_params=pltpu.CompilerParams(
            dimension_semantics=("parallel", "parallel"),
            vmem_limit_bytes=vmem_limit,
        ),
        cost_estimate=cost,
    )(x_flat, weight, b)

    if hw_pad != HW:
        out_flat = out_flat[:, :, :HW]
    # (N, Cout, H*W) -> NCHW: pure reshape.
    return out_flat.reshape(N, Cout, H, W)


def reference(x_nchw, weight, bias):
    v1 = jnp.einsum("nchw,oc->nohw", x_nchw, weight) + bias[None, :, None, None]
    return jnp.where(v1 > 0, v1, v1 * NEGATIVE_SLOPE)


if __name__ == "__main__":
    key = jax.random.PRNGKey(0)
    kx, kw, kb = jax.random.split(key, 3)

    N, Cin, H, W = 2, 7, 16, 16
    Cout = 14

    x = jax.random.normal(kx, (N, Cin, H, W), dtype=jnp.float32)
    # Deterministic parameter init (kaiming-uniform-ish bounds like PyTorch Conv2d)
    bound = 1.0 / (Cin ** 0.5)
    weight = jax.random.uniform(kw, (Cout, Cin), minval=-bound, maxval=bound,
                                dtype=jnp.float32)
    bias = jax.random.uniform(kb, (Cout,), minval=-bound, maxval=bound,
                              dtype=jnp.float32)

    out = conv1x1_leaky(x, weight, bias)
    jax.block_until_ready(out)

    ref = reference(x, weight, bias)
    assert out.shape == (N, Cout, H, W)
    assert jnp.allclose(out, ref, atol=1e-5, rtol=1e-5)

    print("KERNEL_OK")
</pallas_src>

<mosaic_0001>
module attributes {stable_mosaic.version = 11 : i64} {
  func.func @_conv1x1_leaky_kernel(%arg0: i32, %arg1: i32, %arg2: memref<2x7x256xf32, #tpu.memory_space<vmem>>, %arg3: memref<14x7xf32, #tpu.memory_space<vmem>>, %arg4: memref<14x1xf32, #tpu.memory_space<vmem>>, %arg5: memref<2x14x256xf32, #tpu.memory_space<vmem>>) attributes {dimension_semantics = [#tpu.dimension_semantics<parallel>, #tpu.dimension_semantics<parallel>], iteration_bounds = array<i64: 1, 1>, scalar_prefetch = 0 : i64, scratch_operands = 0 : i64, tpu.core_type = #tpu.core_type<tc>, window_params = [{transform_indices = @transform_0, window_bounds = array<i64: 2, 7, 256>}, {pipeline_mode = #tpu.pipeline_mode<synchronous>, transform_indices = @transform_1, window_bounds = array<i64: 14, 7>}, {pipeline_mode = #tpu.pipeline_mode<synchronous>, transform_indices = @transform_2, window_bounds = array<i64: 14, 1>}, {transform_indices = @transform_3, window_bounds = array<i64: 2, 14, 256>}]} {
    %c0 = arith.constant 0 : index
    %c0_0 = arith.constant 0 : index
    %0 = vector.load %arg3[%c0, %c0_0] : memref<14x7xf32, #tpu.memory_space<vmem>>, vector<14x7xf32>
    %c0_1 = arith.constant 0 : index
    %c0_2 = arith.constant 0 : index
    %1 = vector.load %arg4[%c0_1, %c0_2] : memref<14x1xf32, #tpu.memory_space<vmem>>, vector<14x1xf32>
    %c0_3 = arith.constant 0 : index
    %c0_4 = arith.constant 0 : index
    %c0_5 = arith.constant 0 : index
    %2 = vector.load %arg2[%c0_3, %c0_4, %c0_5] : memref<2x7x256xf32, #tpu.memory_space<vmem>>, vector<1x7x256xf32>
    %3 = vector.shape_cast %2 : vector<1x7x256xf32> to vector<7x256xf32>
    %cst = arith.constant dense<0.000000e+00> : vector<14x256xf32>
    %4 = tpu.matmul %0, %3, %cst {dimension_numbers = #tpu.dot_dimension_numbers<[1], [0], [0], [1], [0, 0, 1, 1], [], []>} : vector<14x7xf32>, vector<7x256xf32>, vector<14x256xf32> -> vector<14x256xf32>
    %5 = vector.broadcast %1 : vector<14x1xf32> to vector<14x256xf32>
    %6 = arith.addf %4, %5 : vector<14x256xf32>
    %cst_6 = arith.constant 0.000000e+00 : f32
    %7 = vector.broadcast %cst_6 : f32 to vector<14x256xf32>
    %8 = arith.cmpf ogt, %6, %7 : vector<14x256xf32>
    %cst_7 = arith.constant -0.316821247 : f32
    %9 = vector.broadcast %cst_7 : f32 to vector<14x256xf32>
    %10 = arith.mulf %6, %9 : vector<14x256xf32>
    %11 = arith.select %8, %6, %10 : vector<14x256xi1>, vector<14x256xf32>
    %c0_8 = arith.constant 0 : index
    %c0_9 = arith.constant 0 : index
    %c0_10 = arith.constant 0 : index
    %12 = vector.load %arg5[%c0_8, %c0_9, %c0_10] : memref<2x14x256xf32, #tpu.memory_space<vmem>>, vector<1x14x256xf32>
    %13 = vector.shape_cast %12 : vector<1x14x256xf32> to vector<14x256xf32>
    %14 = vector.shape_cast %11 : vector<14x256xf32> to vector<1x14x256xf32>
    tpu.vector_store %arg5[%c0_8, %c0_9, %c0_10], %14 {strides = array<i32>} : memref<2x14x256xf32, #tpu.memory_space<vmem>>, vector<1x14x256xf32>,
    %c1 = arith.constant 1 : index
    %c0_11 = arith.constant 0 : index
    %c0_12 = arith.constant 0 : index
    %15 = vector.load %arg2[%c1, %c0_11, %c0_12] : memref<2x7x256xf32, #tpu.memory_space<vmem>>, vector<1x7x256xf32>
    %16 = vector.shape_cast %15 : vector<1x7x256xf32> to vector<7x256xf32>
    %cst_13 = arith.constant dense<0.000000e+00> : vector<14x256xf32>
    %17 = tpu.matmul %0, %16, %cst_13 {dimension_numbers = #tpu.dot_dimension_numbers<[1], [0], [0], [1], [0, 0, 1, 1], [], []>} : vector<14x7xf32>, vector<7x256xf32>, vector<14x256xf32> -> vector<14x256xf32>
    %18 = vector.broadcast %1 : vector<14x1xf32> to vector<14x256xf32>
    %19 = arith.addf %17, %18 : vector<14x256xf32>
    %cst_14 = arith.constant 0.000000e+00 : f32
    %20 = vector.broadcast %cst_14 : f32 to vector<14x256xf32>
    %21 = arith.cmpf ogt, %19, %20 : vector<14x256xf32>
    %cst_15 = arith.constant -0.316821247 : f32
    %22 = vector.broadcast %cst_15 : f32 to vector<14x256xf32>
    %23 = arith.mulf %19, %22 : vector<14x256xf32>
    %24 = arith.select %21, %19, %23 : vector<14x256xi1>, vector<14x256xf32>
    %c1_16 = arith.constant 1 : index
    %c0_17 = arith.constant 0 : index
    %c0_18 = arith.constant 0 : index
    %25 = vector.load %arg5[%c1_16, %c0_17, %c0_18] : memref<2x14x256xf32, #tpu.memory_space<vmem>>, vector<1x14x256xf32>
    %26 = vector.shape_cast %25 : vector<1x14x256xf32> to vector<14x256xf32>
    %27 = vector.shape_cast %24 : vector<14x256xf32> to vector<1x14x256xf32>
    tpu.vector_store %arg5[%c1_16, %c0_17, %c0_18], %27 {strides = array<i32>} : memref<2x14x256xf32, #tpu.memory_space<vmem>>, vector<1x14x256xf32>,
    return
  }
  func.func @transform_0(%arg0: i32, %arg1: i32) -> (i32, i32, i32) {
    %c0_i32 = arith.constant 0 : i32
    %c0_i32_0 = arith.constant 0 : i32
    return %arg0, %c0_i32, %arg1 : i32, i32, i32
  }
  func.func @transform_1(%arg0: i32, %arg1: i32) -> (i32, i32) {
    %c0_i32 = arith.constant 0 : i32
    %c0_i32_0 = arith.constant 0 : i32
    %c0_i32_1 = arith.constant 0 : i32
    return %c0_i32, %c0_i32_0 : i32, i32
  }
  func.func @transform_2(%arg0: i32, %arg1: i32) -> (i32, i32) {
    %c0_i32 = arith.constant 0 : i32
    %c0_i32_0 = arith.constant 0 : i32
    %c0_i32_1 = arith.constant 0 : i32
    return %c0_i32, %c0_i32_0 : i32, i32
  }
  func.func @transform_3(%arg0: i32, %arg1: i32) -> (i32, i32, i32) {
    %c0_i32 = arith.constant 0 : i32
    %c0_i32_0 = arith.constant 0 : i32
    return %arg0, %c0_i32, %arg1 : i32, i32, i32
  }
}

</mosaic_0001>

<bundles_post_ra>
// kernel: tpu_custom_call.1
= control target key start
LH: loop header
LB: loop body
LE: loop exit
PB: predicated region body
PF: predicated region fallthrough
CT: control target
= control target key end

     0   :  { %vm37_vm0 = vcmask 1046528   ;;  %vm30_vm1 = vcmask 56320   ;;  %v261_v3 = vmov 0.0   ;;  %v262_v8 = vmov 0   ;;  %s335_s0 = inlined_call_operand.vmem [shape: f32[2,7,256], index: 0, kind: input, shape index: {}]   ;;  %s336_s1 = inlined_call_operand.vmem [shape: f32[14,7], index: 1, kind: input, shape index: {}]   ;;  %s337_s2 = inlined_call_operand.vmem [shape: f32[14,1], index: 2, kind: input, shape index: {}]   ;;  %s338_s3 = inlined_call_operand.vmem [shape: f32[2,14,256], index: 3, kind: output, shape index: {}]  }
   0x1   :  { %v19_v0 = vld [vmem:[%s335_s0 + $0x8] sm:$0x7f]  ;;  %v249_v1 = vld [vmem:[%s335_s0 + $0x18] sm:$0x7f]  ;;  %v18_v2 = vld [vmem:[%s335_s0] sm:$0x7f]  ;;  %108 = vmatprep.mubr.f32.mxu0 %v261_v3  ;;  %210 = vmatprep.mubr.f32.mxu1 %v261_v3 }
   0x2   :  { %244 = vmatprep.subr.msk.mxu0 %vm37_vm0, %v19_v0  ;;  %250 = vmatprep.subr.msk.mxu1 %vm37_vm0, %v249_v1  ;;  %v248_v4 = vld [vmem:[%s335_s0 + $0x10] sm:$0x7f]  ;;  %v14_v5 = vld [vmem:[%s336_s1] sm:$0xff]  ;;  %v15_v7 = vld [vmem:[%s336_s1 + $0x8] sm:$0x3f] }
   0x3   :  { %245 = vmatpush1.msk.msra.mxu0 %vm37_vm0, %v18_v2  ;;  %251 = vmatpush1.msk.msra.mxu1 %vm37_vm0, %v248_v4  ;;  %v16_v6 = vld [vmem:[%s337_s2] sm:$0xff]  ;;  %v17_v9 = vld [vmem:[%s337_s2 + $0x8] sm:$0x3f] }
   0x4   :  { %246 = vmatmul.mubr.msk.f32.vlgmr.msra.gmra.mrb[0].mxu0 %vm30_vm1, %v14_v5  ;;  %252 = vmatmul.mubr.msk.f32.vlgmr.msra.gmra.mrb[0].mxu1 %vm30_vm1, %v14_v5 }
   0x5   :  { %114 = vmatprep.mubr.f32.mxu0 %v261_v3  ;;  %216 = vmatprep.mubr.f32.mxu1 %v261_v3 }
   0x6   :  { %260 = vset.pattern.permute.xlu0 %v262_v8 }
   0x7   :  { %22 = vperm.xlu0 %260, %v16_v6  }
   0x8   :  { %247 = vmatmul.mubr.msk.f32.gmra.mrb[2].mxu0 %vm30_vm1, %v15_v7  ;;  %253 = vmatmul.mubr.msk.f32.gmra.mrb[2].mxu1 %vm30_vm1, %v15_v7 }
   0xb   :  { %27 = vperm.xlu0 %260, %v17_v9  }
  0x86   :  { %v23_v10 = vpop.permute.xlu0 %22 }
  0x8a   :  { %v28_v21 = vpop.permute.xlu0 %27 }
  0xd7   :  { %v110_v11 = vpop.f32.mrb[0].mxu0  ;;  %v212_v12 = vpop.f32.mrb[0].mxu1 }
  0xd8   :  { %v111_v13 = vadd.f32 %v110_v11, %v23_v10  ;;  %v213_v14 = vadd.f32 %v212_v12, %v23_v10  ;;  %v112_v15 = vpop.f32.mrb[1].mxu0  ;;  %v214_v16 = vpop.f32.mrb[1].mxu1 }
  0xd9   :  { %v113_v17 = vadd.f32 %v112_v15, %v23_v10  ;;  %v215_v18 = vadd.f32 %v214_v16, %v23_v10 }
  0xda   :  { %vm121_vm2 = vcmp.gt.f32.partialorder %v111_v13, 0.0  ;;  %v125_v19 = vmul.f32 -0.31682125, %v111_v13  ;;  %vm223_vm3 = vcmp.gt.f32.partialorder %v213_v14, 0.0  ;;  %v227_v20 = vmul.f32 -0.31682125, %v213_v14 }
  0xdb   :  { %vm122_vm4 = vcmp.gt.f32.partialorder %v113_v17, 0.0  ;;  %v126_v22 = vmul.f32 -0.31682125, %v113_v17  ;;  %vm224_vm5 = vcmp.gt.f32.partialorder %v215_v18, 0.0  ;;  %v228_v23 = vmul.f32 -0.31682125, %v215_v18 }
  0xdc   :  { %v129_v24 = vsel %vm121_vm2, %v111_v13, %v125_v19  ;;  %v231_v25 = vsel %vm223_vm3, %v213_v14, %v227_v20  ;;  %v116_v26 = vpop.f32.mrb[2].mxu0  ;;  %v218_v27 = vpop.f32.mrb[2].mxu1 }
  0xdd   :  { %133 = vst [vmem:[%s338_s3] sm:$0xff] %v129_v24  ;;  %254 = vst [vmem:[%s338_s3 + $0x20] sm:$0xff] %v231_v25  ;;  %v130_v28 = vsel %vm122_vm4, %v113_v17, %v126_v22  ;;  %v232_v29 = vsel %vm224_vm5, %v215_v18, %v228_v23  ;;  %v117_v30 = vadd.f32 %v116_v26, %v28_v21  ;;  %v118_v32 = vpop.f32.mrb[3].mxu0  ;;  %v220_v33 = vpop.f32.mrb[3].mxu1 }
  0xde   :  { %v219_v31 = vadd.f32 %v218_v27, %v28_v21  ;;  %134 = vst [vmem:[%s338_s3 + $0x8] sm:$0xff] %v130_v28  ;;  %255 = vst [vmem:[%s338_s3 + $0x28] sm:$0xff] %v232_v29  ;;  %v119_v34 = vadd.f32 %v118_v32, %v28_v21  ;;  %v221_v35 = vadd.f32 %v220_v33, %v28_v21 }
  0xdf   :  { %vm123_vm6 = vcmp.gt.f32.partialorder %v117_v30, 0.0  ;;  %v127_v36 = vmul.f32 -0.31682125, %v117_v30 }
  0xe0   :  { %vm225_vm7 = vcmp.gt.f32.partialorder %v219_v31, 0.0  ;;  %v229_v37 = vmul.f32 -0.31682125, %v219_v31  ;;  %vm124_vm8 = vcmp.gt.f32.partialorder %v119_v34, 0.0  ;;  %v128_v38 = vmul.f32 -0.31682125, %v119_v34 }
  0xe1   :  { %vm226_vm9 = vcmp.gt.f32.partialorder %v221_v35, 0.0  ;;  %v230_v39 = vmul.f32 -0.31682125, %v221_v35  ;;  %v131_v40 = vsel %vm123_vm6, %v117_v30, %v127_v36 }
  0xe2   :  { %v233_v41 = vsel %vm225_vm7, %v219_v31, %v229_v37  ;;  %135 = vst [vmem:[%s338_s3 + $0x10] sm:$0x3f] %v131_v40  ;;  %v132_v42 = vsel %vm124_vm8, %v119_v34, %v128_v38 }
  0xe3   :  { %256 = vst [vmem:[%s338_s3 + $0x30] sm:$0x3f] %v233_v41  ;;  %v234_v43 = vsel %vm226_vm9, %v221_v35, %v230_v39  ;;  %136 = vst [vmem:[%s338_s3 + $0x18] sm:$0x3f] %v132_v42 }
  0xe4   :  { %257 = vst [vmem:[%s338_s3 + $0x38] sm:$0x3f] %v234_v43 }

</bundles_post_ra>
